<compile_context>
chip_gen: v5e
topology: v5e:2x2
jax: 0.10.0
libtpu: 0.0.40
codegen_flags: <defaults>
</compile_context>

<pallas_src>
import jax
import jax.numpy as jnp
from jax.experimental import pallas as pl
from jax.experimental.pallas import tpu as pltpu

_LANE = 128


def _pointwise_conv1d_kernel(x_ref, w_ref, b_ref, o_ref):
    # x_ref: (C_in, TT)    time tile of the current batch element
    # w_ref: (CO_T, C_in)  C_out tile of the weight (resident across b, t)
    # b_ref: (CO_T, 1)     f32 bias column (resident across b, t)
    # o_ref: (CO_T, TT)    output tile
    y = jnp.dot(w_ref[...], x_ref[...], preferred_element_type=jnp.float32)
    y = y + b_ref[...]                       # bias broadcast over time, in f32
    o_ref[...] = y.astype(o_ref.dtype)


def _round_up(x, m):
    return ((x + m - 1) // m) * m


def _choose_cout_tile(c_out, c_in, w_itemsize, weight_budget=4 * 1024 * 1024):
    # Keep the whole weight resident when it is small; otherwise tile C_out in
    # sublane-aligned 256-row blocks.
    # TODO(synk): for very large C_in also tile the reduction axis with an f32
    # VMEM accumulator + pl.when init/finalize (standard P3 pattern).
    if c_out <= 256 or c_out * c_in * w_itemsize <= weight_budget:
        return c_out
    return 256


def _choose_time_tile(t, c_in, co_t, x_itemsize, out_itemsize, w_itemsize,
                      max_time_tile, vmem_budget):
    """Largest multiple-of-128 time tile that keeps double-buffered VMEM bounded."""
    if t <= _LANE:
        return t                                   # single full-extent block
    cap = max(_LANE, (min(t, max_time_tile) // _LANE) * _LANE)
    fixed = 2 * co_t * c_in * w_itemsize           # double-buffered weight tile
    tt = cap
    while tt > _LANE:
        per_step = 2 * tt * (c_in * x_itemsize + co_t * out_itemsize)
        if fixed + per_step <= vmem_budget:
            break
        tt -= _LANE
    return tt


def pointwise_conv1d(x, weight, bias=None, *, stride=1, padding=0,
                     compute_dtype=None, max_time_tile=2048,
                     vmem_budget_bytes=20 * 1024 * 1024):
    """Pointwise (kernel_size=1) 1-D convolution.

    Args:
      x:      (B, C_in, T) input, NCT layout (PyTorch Conv1d convention).
      weight: (C_out, C_in) weight (PyTorch (C_out, C_in, 1) with the trailing
              kernel dim squeezed).
      bias:   (C_out,) bias, or None.
      compute_dtype: optional narrower dtype (e.g. jnp.bfloat16) for x/weight;
              accumulation and bias add stay f32.
    Returns:
      (B, C_out, T_out), T_out = floor((T + 2*padding - 1)/stride) + 1.
    """
    # Glue for non-default stride/padding (kernel_size == 1 so stride == subsample).
    if padding:
        # TODO(synk): fuse zero-padding into the kernel (k=1 => padded output
        # columns are pure bias) instead of an extra HBM pad pass.
        x = jnp.pad(x, ((0, 0), (0, 0), (padding, padding)))
    if stride != 1:
        # TODO(synk): fold the stride into the time index_map / an in-kernel
        # strided read instead of materializing a strided HBM copy.
        x = x[:, :, ::stride]

    B, C_in, T = x.shape
    C_out = weight.shape[0]
    out_dtype = x.dtype

    if bias is None:
        bias = jnp.zeros((C_out,), dtype=jnp.float32)

    if compute_dtype is not None:
        x = x.astype(compute_dtype)
        weight = weight.astype(compute_dtype)

    bias_col = bias.reshape(C_out, 1).astype(jnp.float32)

    co_t = _choose_cout_tile(C_out, C_in, weight.dtype.itemsize)
    tt = _choose_time_tile(
        T, C_in, co_t,
        x.dtype.itemsize, jnp.dtype(out_dtype).itemsize, weight.dtype.itemsize,
        max_time_tile, vmem_budget_bytes)

    grid = (B, pl.cdiv(C_out, co_t), pl.cdiv(T, tt))

    return pl.pallas_call(
        _pointwise_conv1d_kernel,
        out_shape=jax.ShapeDtypeStruct((B, C_out, T), out_dtype),
        grid=grid,
        in_specs=[
            # activation time tile for batch b (kernel sees (C_in, tt))
            pl.BlockSpec((pl.Squeezed(), C_in, tt), lambda b, co, t: (b, 0, t)),
            # weight / bias: constant over (b, t) -> stay resident in VMEM
            pl.BlockSpec((co_t, C_in), lambda b, co, t: (co, 0)),
            pl.BlockSpec((co_t, 1), lambda b, co, t: (co, 0)),
        ],
        out_specs=pl.BlockSpec((pl.Squeezed(), co_t, tt),
                               lambda b, co, t: (b, co, t)),
        compiler_params=pltpu.CompilerParams(
            dimension_semantics=("parallel", "parallel", "parallel"),
            vmem_limit_bytes=32 * 1024 * 1024,
        ),
    )(x, weight, bias_col)


if __name__ == "__main__":
    # Small shapes consistent with the module's forward: (batch, in_channels, time)
    B, C_in, C_out, T = 2, 8, 16, 512

    key = jax.random.PRNGKey(0)
    kx, kw, kb = jax.random.split(key, 3)

    x = jax.random.normal(kx, (B, C_in, T), dtype=jnp.float32)
    # Deterministic params (Conv1d weight (C_out, C_in, 1) with kernel dim squeezed).
    weight = jax.random.normal(kw, (C_out, C_in), dtype=jnp.float32) * (1.0 / C_in ** 0.5)
    bias = jax.random.normal(kb, (C_out,), dtype=jnp.float32) * 0.1

    def ref_conv(x, w, b, stride=1, padding=0):
        xp = jnp.pad(x, ((0, 0), (0, 0), (padding, padding))) if padding else x
        xs = xp[:, :, ::stride] if stride != 1 else xp
        return jnp.einsum("oc,bct->bot", w, xs) + b[None, :, None]

    # Case 1: default stride/padding.
    out1 = jax.block_until_ready(pointwise_conv1d(x, weight, bias))
    ref1 = ref_conv(x, weight, bias)
    assert out1.shape == ref1.shape
    assert jnp.allclose(out1, ref1, atol=1e-5, rtol=1e-5)

    # Case 2: force multiple time tiles (exercises the pipelined 3-D grid).
    out2 = jax.block_until_ready(
        pointwise_conv1d(x, weight, bias, max_time_tile=128))
    assert jnp.allclose(out2, ref1, atol=1e-5, rtol=1e-5)

    # Case 3: stride + padding (nn.Conv1d k=1 semantics, partial last time tile).
    out3 = jax.block_until_ready(
        pointwise_conv1d(x, weight, bias, stride=2, padding=1))
    ref3 = ref_conv(x, weight, bias, stride=2, padding=1)
    assert out3.shape == ref3.shape
    assert jnp.allclose(out3, ref3, atol=1e-5, rtol=1e-5)

    print("KERNEL_OK")
</pallas_src>

<mosaic_0001>
module attributes {stable_mosaic.version = 11 : i64} {
  func.func @_pointwise_conv1d_kernel(%arg0: i32, %arg1: i32, %arg2: i32, %arg3: memref<1x8x512xf32, #tpu.memory_space<vmem>>, %arg4: memref<16x8xf32, #tpu.memory_space<vmem>>, %arg5: memref<16x1xf32, #tpu.memory_space<vmem>>, %arg6: memref<1x16x512xf32, #tpu.memory_space<vmem>>) attributes {dimension_semantics = [#tpu.dimension_semantics<parallel>, #tpu.dimension_semantics<parallel>, #tpu.dimension_semantics<parallel>], iteration_bounds = array<i64: 2, 1, 1>, scalar_prefetch = 0 : i64, scratch_operands = 0 : i64, tpu.core_type = #tpu.core_type<tc>, window_params = [{transform_indices = @transform_0, window_bounds = array<i64: 1, 8, 512>}, {transform_indices = @transform_1, window_bounds = array<i64: 16, 8>}, {transform_indices = @transform_2, window_bounds = array<i64: 16, 1>}, {transform_indices = @transform_3, window_bounds = array<i64: 1, 16, 512>}]} {
    %c0 = arith.constant 0 : index
    %c0_0 = arith.constant 0 : index
    %0 = vector.load %arg4[%c0, %c0_0] : memref<16x8xf32, #tpu.memory_space<vmem>>, vector<16x8xf32>
    %c0_1 = arith.constant 0 : index
    %c0_2 = arith.constant 0 : index
    %c0_3 = arith.constant 0 : index
    %1 = vector.load %arg3[%c0_1, %c0_2, %c0_3] : memref<1x8x512xf32, #tpu.memory_space<vmem>>, vector<1x8x512xf32>
    %2 = vector.shape_cast %1 : vector<1x8x512xf32> to vector<8x512xf32>
    %cst = arith.constant dense<0.000000e+00> : vector<16x512xf32>
    %3 = tpu.matmul %0, %2, %cst {dimension_numbers = #tpu.dot_dimension_numbers<[1], [0], [0], [1], [0, 0, 1, 1], [], []>} : vector<16x8xf32>, vector<8x512xf32>, vector<16x512xf32> -> vector<16x512xf32>
    %c0_4 = arith.constant 0 : index
    %c0_5 = arith.constant 0 : index
    %4 = vector.load %arg5[%c0_4, %c0_5] : memref<16x1xf32, #tpu.memory_space<vmem>>, vector<16x1xf32>
    %5 = vector.broadcast %4 : vector<16x1xf32> to vector<16x512xf32>
    %6 = arith.addf %3, %5 : vector<16x512xf32>
    %c0_6 = arith.constant 0 : index
    %c0_7 = arith.constant 0 : index
    %c0_8 = arith.constant 0 : index
    %7 = vector.load %arg6[%c0_6, %c0_7, %c0_8] : memref<1x16x512xf32, #tpu.memory_space<vmem>>, vector<1x16x512xf32>
    %8 = vector.shape_cast %7 : vector<1x16x512xf32> to vector<16x512xf32>
    %9 = vector.shape_cast %6 : vector<16x512xf32> to vector<1x16x512xf32>
    tpu.vector_store %arg6[%c0_6, %c0_7, %c0_8], %9 {strides = array<i32>} : memref<1x16x512xf32, #tpu.memory_space<vmem>>, vector<1x16x512xf32>,
    return
  }
  func.func @transform_0(%arg0: i32, %arg1: i32, %arg2: i32) -> (i32, i32, i32) {
    %c0_i32 = arith.constant 0 : i32
    %c0_i32_0 = arith.constant 0 : i32
    return %arg0, %c0_i32, %arg2 : i32, i32, i32
  }
  func.func @transform_1(%arg0: i32, %arg1: i32, %arg2: i32) -> (i32, i32) {
    %c0_i32 = arith.constant 0 : i32
    %c0_i32_0 = arith.constant 0 : i32
    return %arg1, %c0_i32 : i32, i32
  }
  func.func @transform_2(%arg0: i32, %arg1: i32, %arg2: i32) -> (i32, i32) {
    %c0_i32 = arith.constant 0 : i32
    %c0_i32_0 = arith.constant 0 : i32
    return %arg1, %c0_i32 : i32, i32
  }
  func.func @transform_3(%arg0: i32, %arg1: i32, %arg2: i32) -> (i32, i32, i32) {
    %c0_i32 = arith.constant 0 : i32
    return %arg0, %arg1, %arg2 : i32, i32, i32
  }
}

</mosaic_0001>

<bundles_post_ra>
// kernel: tpu_custom_call.1
= control target key start
LH: loop header
LB: loop body
LE: loop exit
PB: predicated region body
PF: predicated region fallthrough
CT: control target
= control target key end

     0   :  { %8 = vsyncpa [#allocation3], 0  ;;  %s902_s0 = inlined_call_operand.hbm [shape: f32[2,8,512], index: 0, kind: input, shape index: {}]   ;;  %s903_s1 = inlined_call_operand.vmem [shape: f32[16,8], index: 1, kind: input, shape index: {}]   ;;  %s904_s2 = inlined_call_operand.vmem [shape: f32[16,1], index: 2, kind: input, shape index: {}]   ;;  %s905_s3 = inlined_call_operand.hbm [shape: f32[2,16,512], index: 3, kind: output, shape index: {}]  }
   0x1   :  { %10 = vsyncpa [#allocation3 + $0x1], 0 }
   0x2   :  { %11 = vsyncpa [#allocation4], 0 }
   0x3   :  { %13 = vsyncpa [#allocation4 + $0x1], 0  ;;  %s761_s12 = smov 0   ;;  %s763_s13 = smov 0  }
   0x4   :  { %s765_s14 = smov 0   ;;  %s767_s15 = smov 0  }
   0x5   :  { %s769_s16 = smov 0   ;;  %s771_s17 = smov 0  }
   0x6 LB: > { %s531_s18 = sadd.s32 4294967295, %s736_s17   ;;  %s532_s19 = sadd.s32 4294967294, %s736_s17   ;;  %s736_s17 = sphi %s771_s17, %s19_s17   ;;  %s732_s16 = sphi %s769_s16, %s914_s16   ;;  %s728_s15 = sphi %s767_s15, %s913_s15   ;;  %s724_s14 = sphi %s765_s14, %s912_s14   ;;  %s720_s13 = sphi %s763_s13, %s911_s13   ;;  %s716_s12 = sphi %s761_s12, %s910_s12  }
   0x7   : > { %s38_s20 = sadd.s32 1, %s732_s16  ;;  %s47_s21 = sadd.s32 1, %s724_s14 }
   0x8   : > { %p40_p0 = scmp.ge.s32.totalorder %s38_s20, 2  ;;  %p54_p1 = scmp.ne.s32.totalorder %s724_s14, %s720_s13 }
   0x9   : > { %p55_p2 = scmp.eq.s32.totalorder %s736_s17, 0  ;;  %p60_p3 = scmp.ne.s32.totalorder %s720_s13, %s716_s12 }
   0xa   : > { %s916_s20 = smov (%p40_p0, %s38_s20), 0  ;;  %p61_p5 = scmp.eq.s32.totalorder %s531_s18, 0 }
   0xb   : > { %p802_p4 = por %p55_p2, %p54_p1  ;;  %s42_s23 = ssub.s32 %s732_s16, %s916_s20 }
   0xc   : > { %p140_p6 = scmp.eq.s32.totalorder %s531_s18, 1  ;;  %p45_p7 = scmp.eq.s32.totalorder %s42_s23, 0 }
   0xd   : > { %p808_p8 = por %p61_p5, %p60_p3  ;;  %p146_p10 = scmp.eq.s32.totalorder %s532_s19, 1 }
   0xe   : > { %p812_p9 = por %p140_p6, %p54_p1  ;;  %p536_p12 = scmp.ge.s32.totalorder %s736_s17, 2 }
   0xf   : > { %s817_s26 = scalar_select %p45_p7, %s724_s14, %s47_s21  }
  0x10   : > { %p819_p11 = por %p146_p10, %p60_p3  ;;  %p570_p13 = scmp.lt.s32.totalorder %s736_s17, 2 }
  0x11   : > { %s184_s28 = sand.u32 1, %s724_s14   ;;  %s556_s30 = sshll.u32 %s732_s16, 5 }
  0x12   : > { %s537_s29 = sshll.u32 %s184_s28, 5  ;;  %s195_s6 = scalar_lea.hbm %s902_s0, %s556_s30 }
  0x13   : > { %s188_s7 = scalar_lea.vmem [#allocation2], %s537_s29  ;;  %s197_s9 = sshll.u32 %s195_s6, 4  ;;  %s198_s9 = int_to_ptr.hbm [resolvable:$true] %s197_s9 }
  0x14   : > { %s199_s8 = sshll.u32 %s188_s7, 4  ;;  %p563_p0 = pnand %p570_p13, %p802_p4  ;;  %s200_s8 = int_to_ptr.vmem [resolvable:$true] %s199_s8 }
  0x15   : > { %p540_p1 = scmp.ge.s32.totalorder %s736_s17, 1  ;;  %p204_p2 = scmp.lt.s32.totalorder %s736_s17, 3 }
  0x16   : > { %s185_s10 = scalar_lea.sflag [#allocation3], %s184_s28 }
  0x17   : > { %565 = dma.hbm_to_vmem [thread:$0]  (!%p563_p0), %s198_s9, 512, %s200_s8, %s185_s10  }
  0x18   : > { %p205_p3 = pnand %p540_p1, %p204_p2 }
  0x19   : > { %s835_s11 = sand.u32 (!%p205_p3), 1, %s720_s13  }
  0x1a   : > { %208 = sbr.rel (%p205_p3) target bundleno = 183 (0xb7), region = 32  ;;  %s541_s18 = sshll.u32 (!%p205_p3), %s835_s11, 5 }
  0x1b   : > { %s211_s19 = scalar_lea.sflag (!%p205_p3), [#allocation3], %s835_s11  ;;  %s214_s21 = scalar_lea.vmem (!%p205_p3), [#allocation2], %s541_s18 }
  0x1f   : > { %707 = dma.done.wait (%p808_p8), %s211_s19, 512  }
  0x20   : > { %709 = vsyncadd (%p808_p8), %s211_s19, 4294966784  ;;  %v738_v0 = vmov 0   ;;  %v265_v1 = vld [vmem:[%s214_s21] sm:$0xff]  ;;  %v266_v2 = vld [vmem:[%s214_s21 + $0x8] sm:$0xff]  ;;  %vm281_vm0 = vcmask 64512   ;;  %s542_s6 = sshll.u32 %s835_s11, 6 }
  0x21   : > { %623 = vset.pattern.permute.xlu0 %v738_v0  ;;  %v267_v3 = vld [vmem:[%s214_s21 + $0x10] sm:$0xff]  ;;  %303 = vmatpush.msra.mxu0 %v265_v1  ;;  %v268_v4 = vld [vmem:[%s214_s21 + $0x18] sm:$0xff]  ;;  %v263_v5 = vld [vmem:[%s903_s1] sm:$0xff]  ;;  %s247_s7 = scalar_lea.vmem [#allocation5], %s542_s6  ;;  %s557_s8 = sshll.u32 %s728_s15, 6 }
  0x22   : > { %326 = vmatpush.msra.mxu1 %v266_v2  ;;  %349 = vmatpush.msra.mxu2 %v267_v3  ;;  %v269_v6 = vld [vmem:[%s904_s2] sm:$0xff]  ;;  %v264_v7 = vld [vmem:[%s903_s1 + $0x8] sm:$0xff]  ;;  %s405_s18 = scalar_lea.hbm %s905_s3, %s557_s8  ;;  %s406_s19 = sshll.u32 %s247_s7, 4  ;;  %s407_s19 = int_to_ptr.vmem [resolvable:$true] %s406_s19 }
  0x23   : > { %372 = vmatpush.msra.mxu3 %v268_v4  ;;  %543 = vmatmul.msk.f32.vlgmr.msra.gmra.mxu0 %vm281_vm0, %v263_v5  ;;  %v270_v8 = vld [vmem:[%s904_s2 + $0x8] sm:$0xff]  ;;  %s408_s21 = sshll.u32 %s405_s18, 4  ;;  %s389_s15 = scalar_lea.sflag [#allocation4], %s835_s11  ;;  %s409_s21 = int_to_ptr.hbm [resolvable:$true] %s408_s21 }
  0x24   : > { %545 = vmatmul.msk.f32.vlgmr.msra.gmra.mxu1 %vm281_vm0, %v263_v5  ;;  %547 = vmatmul.msk.f32.vlgmr.msra.gmra.mxu2 %vm281_vm0, %v263_v5  ;;  %s668_s22 = sshra.s32 %s409_s21, 4  ;;  %s674_s24 = scalar_lea.hbm %s905_s3, 128  ;;  %s669_s22 = int_to_ptr.hbm [resolvable:$true] %s668_s22 }
  0x25   : > { %549 = vmatmul.msk.f32.vlgmr.msra.gmra.mxu3 %vm281_vm0, %v263_v5  ;;  %273 = vperm.xlu0 %623, %v269_v6   ;;  %s670_s23 = scalar_lea.hbm %s669_s22, 64  ;;  %p675_p7 = scmp.lt.s32.totalorder %s669_s22, %s905_s3 }
  0x26   : > { %p671_p4 = scmp.ne.s32.totalorder %s669_s22, %s670_s23  ;;  %p676_p8 = scmp.lt.s32.totalorder %s674_s24, %s670_s23 }
  0x28   : > { %p672_p5 = pnand %p671_p4, %p812_p9  ;;  %p677_p10 = por %p676_p8, %p675_p7 }
  0x2a   : > { %p673_p6 = pneg %p672_p5 }
  0x2b   : > { %544 = vmatmul.msk.f32.gmra.mxu0 %vm281_vm0, %v264_v7 }
  0x2c   : > { %546 = vmatmul.msk.f32.gmra.mxu1 %vm281_vm0, %v264_v7  ;;  %548 = vmatmul.msk.f32.gmra.mxu2 %vm281_vm0, %v264_v7  ;;  %p678_p13 = pnand %p677_p10, %p673_p6 }
  0x2d   : > { %550 = vmatmul.msk.f32.gmra.mxu3 %vm281_vm0, %v264_v7  ;;  %278 = vperm.xlu0 %623, %v270_v8  }
  0x97   : > { %v274_v9 = vpop.permute.xlu0 %273 }
  0x9f   : > { %v279_v14 = vpop.permute.xlu0 %278 }
  0xa0   : > { %v305_v10 = vpop.f32.mrf.mxu0 }
  0xa1   : > { %v328_v11 = vpop.f32.mrf.mxu1  ;;  %v306_v12 = vadd.f32 %v305_v10, %v274_v9 }
  0xa2   : > { %v329_v13 = vadd.f32 %v328_v11, %v274_v9 }
  0xa3   : > { %380 = vst [vmem:[%s247_s7] sm:$0xff] %v306_v12 }
  0xa4   : > { %381 = vst [vmem:[%s247_s7 + $0x8] sm:$0xff] %v329_v13 }
  0xa7   : > { %v351_v15 = vpop.f32.mrf.mxu2 }
  0xa8   : > { %v374_v16 = vpop.f32.mrf.mxu3  ;;  %v352_v17 = vadd.f32 %v351_v15, %v274_v9  ;;  %v308_v19 = vpop.f32.mrf.mxu0 }
  0xa9   : > { %v375_v18 = vadd.f32 %v374_v16, %v274_v9  ;;  %v331_v20 = vpop.f32.mrf.mxu1  ;;  %v309_v21 = vadd.f32 %v308_v19, %v279_v14 }
  0xaa   : > { %v332_v22 = vadd.f32 %v331_v20, %v279_v14  ;;  %382 = vst [vmem:[%s247_s7 + $0x10] sm:$0xff] %v352_v17 }
  0xab   : > { %383 = vst [vmem:[%s247_s7 + $0x18] sm:$0xff] %v375_v18 }
  0xac   : > { %384 = vst [vmem:[%s247_s7 + $0x20] sm:$0xff] %v309_v21 }
  0xad   : > { %385 = vst [vmem:[%s247_s7 + $0x28] sm:$0xff] %v332_v22 }
  0xaf   : > { %v354_v23 = vpop.f32.mrf.mxu2 }
  0xb0   : > { %v377_v24 = vpop.f32.mrf.mxu3  ;;  %v355_v25 = vadd.f32 %v354_v23, %v279_v14 }
  0xb1   : > { %v378_v26 = vadd.f32 %v377_v24, %v279_v14 }
  0xb2   : > { %386 = vst [vmem:[%s247_s7 + $0x30] sm:$0xff] %v355_v25 }
  0xb3   : > { %387 = vst [vmem:[%s247_s7 + $0x38] sm:$0xff] %v378_v26 }
  0xb4   : > { %681 = shalt.err (!%p678_p13)
}
  0xb5   : > { %s739_s11 = smov 512   ;;  %s740_s5 = smov 32  }
  0xb6   : > { %560 = dma.vmem_to_hbm [thread:$0]  (%p812_p9), %s407_s19, 1024, %s409_s21, %s389_s15, %s739_s11, %s739_s11, %s740_s5  }
  0xb7 PF: > { %s423_s6 = sand.u32 1, %s716_s12   ;;  %p567_p0 = pnand %p536_p12, %p819_p11 }
  0xb8   : > { %s424_s7 = scalar_lea.sflag [#allocation4], %s423_s6 }
  0xb9   : > { %p568_p1 = pneg %p567_p0 }
  0xbb   : > { %711 = dma.done.wait (%p568_p1), %s424_s7, 1024  }
  0xbc   : > { %713 = vsyncadd (%p568_p1), %s424_s7, 4294966272  ;;  %s19_s17 = sadd.s32 1, %s736_s17   ;;  %s910_s12 = smov %s720_s13 }
  0xbd   : > { %p16_p2 = scmp.ge.s32.totalorder %s19_s17, 4   ;;  %s911_s13 = smov %s724_s14 }
  0xbe   : > { %s912_s14 = smov %s817_s26  ;;  %s913_s15 = smov %s732_s16 }
  0xbf   : > { %s914_s16 = smov %s916_s20  ;;  %18 = sbr.rel (!%p16_p2) target bundleno = 6 (0x6), region = 83 }
  0xc4   :  { %430 = vsyncpa [#allocation3], 1 }
  0xc5   :  { %432 = vsyncpa [#allocation3 + $0x1], 1 }
  0xc6   :  { %433 = vsyncpa [#allocation4], 1 }
  0xc7   :  { %435 = vsyncpa [#allocation4 + $0x1], 1 }

</bundles_post_ra>
